<compile_context>
chip_gen: v5e
topology: v5e:2x2
jax: 0.10.0
libtpu: 0.0.40
codegen_flags: <defaults>
</compile_context>

<pallas_src>
import jax
import jax.numpy as jnp
from jax.experimental import pallas as pl
from jax.experimental.pallas import tpu as pltpu


# ----------------------------- config / shapes ------------------------------
B = 2                    # batch
N = 16                   # max_num_nodes
E = 24                   # max_num_edges
NODE_DIM = 6             # agent.node_dim
F = 10                   # agent.numerical_feature_size (after Flatten)
HIDDEN = (32, 32)        # cfg['state_encoder_hidden_size']
D = 32                   # cfg['gcn_node_dim']
LANE = 128               # lane-dense slab width


# --------------------------------- kernel -----------------------------------
def mlp_state_encoder_kernel(
    numerical_ref,      # (B, F)
    node_ref,           # (B*N, NODE_DIM)
    edge_part_ref,      # (B*E, EPF)
    edge_idx_ref,       # (B*E, 2) int32, node indices already offset by b*N
    stage_pad_ref,      # (B, SVW)  stage pre-placed at lanes [H1+2D : H1+2D+3]
    w0_ref, b0_ref,     # (F, H0), (1, H0)
    w1p_ref, b1p_ref,   # (H0, SVW), (1, SVW)   w1/b1 placed at lanes [0 : H1]
    wnp_ref, bnp_ref,   # (NODE_DIM, SVW), (1, SVW)  node enc. placed at [H1 : H1+D]
    wenp_ref,           # (NODE_DIM, SVW)  edge enc. node-slice, placed at [H1+D : H1+2D]
    wepp_ref,           # (EPF, SVW)       edge enc. part-slice, placed at [H1+D : H1+2D]
    bep_ref,            # (1, SVW)         edge enc. bias,       placed at [H1+D : H1+2D]
    h_edges_ref,        # out: (B*E, SVW)  lane-dense slab (h_edges at [H1+D : H1+2D])
    sv_ref,             # out: (B, SVW)    = [h_num | nodes_mean | edges_mean | stage | 0]
):
    f32 = jnp.float32
    b = numerical_ref.shape[0]
    bn_rows = node_ref.shape[0]          # B*N
    be_rows = edge_part_ref.shape[0]     # B*E
    n = bn_rows // b
    e = be_rows // b

    # ---- numerical feature encoder: Flatten -> Linear -> Tanh -> Linear -> Tanh
    x = numerical_ref[...]                                                    # (B, F)
    h0 = jnp.tanh(jnp.dot(x, w0_ref[...], preferred_element_type=f32)
                  + b0_ref[...])                                              # (B, H0)
    # second layer weights are zero-padded to the slab width, tanh(0)=0 outside
    # the placement range -> h_num is already at its final lane offset.
    h_num = jnp.tanh(jnp.dot(h0, w1p_ref[...], preferred_element_type=f32)
                     + b1p_ref[...])                                          # (B, SVW)

    # ---- node encoder on flattened (B*N) rows, lane-placed at [H1 : H1+D]
    nf = node_ref[...]                                                        # (B*N, node_d)
    h_nodes = jnp.dot(nf, wnp_ref[...], preferred_element_type=f32) + bnp_ref[...]

    # per-batch node mean via a block-row averaging matmul (B, B*N) @ (B*N, SVW)
    col_n = jax.lax.broadcasted_iota(jnp.int32, (b, bn_rows), 1)
    row_n = jax.lax.broadcasted_iota(jnp.int32, (b, bn_rows), 0)
    avg_n = ((col_n >= row_n * n) & (col_n < row_n * n + n)).astype(f32) * (1.0 / n)
    nodes_mean = jnp.dot(avg_n, h_nodes, preferred_element_type=f32)          # (B, SVW)

    # ---- edge path: both endpoint gathers fused into ONE block-diagonal one-hot,
    #      edge encoder re-associated through a projected node table (2 MXU passes)
    idx = edge_idx_ref[...]                                                   # (B*E, 2)
    cols = jax.lax.broadcasted_iota(jnp.int32, (be_rows, bn_rows), 1)         # (B*E, B*N)
    oh = ((idx[:, 0:1] == cols).astype(f32)
          + (idx[:, 1:2] == cols).astype(f32))                                # (B*E, B*N)
    node_proj = jnp.dot(nf, wenp_ref[...] * 0.5,
                        preferred_element_type=f32)                           # (B*N, SVW)
    h_edges = (jnp.dot(oh, node_proj, preferred_element_type=f32)
               + jnp.dot(edge_part_ref[...], wepp_ref[...],
                         preferred_element_type=f32)
               + bep_ref[...])                                                # (B*E, SVW)
    h_edges_ref[...] = h_edges                                                # lane-dense store

    # per-batch edge mean
    col_e = jax.lax.broadcasted_iota(jnp.int32, (b, be_rows), 1)
    row_e = jax.lax.broadcasted_iota(jnp.int32, (b, be_rows), 0)
    avg_e = ((col_e >= row_e * e) & (col_e < row_e * e + e)).astype(f32) * (1.0 / e)
    edges_mean = jnp.dot(avg_e, h_edges, preferred_element_type=f32)          # (B, SVW)

    # ---- all four pieces already live in disjoint lane ranges -> just add
    sv_ref[...] = h_num + nodes_mean + edges_mean + stage_pad_ref[...]


# --------------------------------- wrapper ----------------------------------
def mlp_state_encoder(numerical, node_feature, edge_part_feature, edge_index,
                      edge_mask, stage, params):
    """Returns (state_policy_road, state_value, edge_mask, stage)."""
    f32 = jnp.float32
    b, f = numerical.shape
    _, n, node_dim = node_feature.shape
    _, e, epf = edge_part_feature.shape
    h0 = params["w0"].shape[1]
    h1 = params["w1"].shape[1]
    d = params["wn"].shape[1]
    s = stage.shape[1]
    sv_used = h1 + 2 * d + s
    svw = max(LANE, ((sv_used + LANE - 1) // LANE) * LANE)

    # Lane-place parameters into the 128-lane slab (zero padding elsewhere).
    # This is one-time layout plumbing on constants, not hot-path compute.
    def place_cols(w, off):
        out = jnp.zeros((w.shape[0], svw), f32)
        return out.at[:, off:off + w.shape[1]].set(w.astype(f32))

    w1p = place_cols(params["w1"], 0)
    b1p = place_cols(params["b1"], 0)
    wnp = place_cols(params["wn"], h1)
    bnp = place_cols(params["bn"], h1)
    wenp = place_cols(params["we_node"], h1 + d)
    wepp = place_cols(params["we_part"], h1 + d)
    bep = place_cols(params["be"], h1 + d)
    stage_pad = place_cols(stage, h1 + 2 * d)                        # (B, svw)

    # Fold batch into the row (sublane) axis; contiguous reshapes are free.
    node_flat = node_feature.reshape(b * n, node_dim).astype(f32)
    edge_part_flat = edge_part_feature.reshape(b * e, epf).astype(f32)
    # Offset node indices by b*N so the per-batch gather becomes one
    # block-diagonal one-hot matmul inside the kernel.
    edge_idx_global = (edge_index.astype(jnp.int32)
                       + (jnp.arange(b, dtype=jnp.int32) * n)[:, None, None]
                       ).reshape(b * e, 2)

    def full(shp):
        return pl.BlockSpec(shp, lambda i, _s=shp: (0,) * len(_s))

    out_shapes = (
        jax.ShapeDtypeStruct((b * e, svw), f32),   # edge slab (h_edges at [h1+d:h1+2d])
        jax.ShapeDtypeStruct((b, svw), f32),       # fused state_value slab
    )

    grid_spec = pltpu.PrefetchScalarGridSpec(
        num_scalar_prefetch=0,
        grid=(1,),
        in_specs=[
            full((b, f)),
            full((b * n, node_dim)),
            full((b * e, epf)),
            full((b * e, 2)),
            full((b, svw)),
            full((f, h0)), full((1, h0)),
            full((h0, svw)), full((1, svw)),
            full((node_dim, svw)), full((1, svw)),
            full((node_dim, svw)),       # we_node (placed)
            full((epf, svw)),            # we_part (placed)
            full((1, svw)),              # be (placed)
        ],
        out_specs=[
            full((b * e, svw)),
            full((b, svw)),
        ],
    )

    h_edges_slab, sv_slab = pl.pallas_call(
        mlp_state_encoder_kernel,
        out_shape=out_shapes,
        grid_spec=grid_spec,
        compiler_params=pltpu.CompilerParams(
            dimension_semantics=("arbitrary",)),
    )(
        numerical.astype(f32), node_flat, edge_part_flat, edge_idx_global, stage_pad,
        params["w0"].astype(f32), params["b0"].astype(f32),
        w1p, b1p, wnp, bnp, wenp, wepp, bep,
    )

    state_policy_road = h_edges_slab[:, h1 + d:h1 + 2 * d].reshape(b, e, d)
    state_value = sv_slab[:, :sv_used]
    return state_policy_road, state_value, edge_mask, stage


# ------------------------------ pure-JAX reference ---------------------------
def reference(numerical, node_feature, edge_part_feature, edge_index, stage, p):
    h = jnp.tanh(numerical @ p["w0"] + p["b0"])
    h = jnp.tanh(h @ p["w1"] + p["b1"])
    e1 = jnp.take_along_axis(node_feature, edge_index[:, :, 0:1], axis=1)
    e2 = jnp.take_along_axis(node_feature, edge_index[:, :, 1:2], axis=1)
    ef = jnp.concatenate([(e1 + e2) / 2.0, edge_part_feature], axis=-1)
    h_nodes = node_feature @ p["wn"] + p["bn"]
    we = jnp.concatenate([p["we_node"], p["we_part"]], axis=0)
    h_edges = ef @ we + p["be"]
    state_value = jnp.concatenate(
        [h, h_nodes.mean(axis=1), h_edges.mean(axis=1), stage], axis=-1)
    return h_edges, state_value


# ----------------------------------- main ------------------------------------
if __name__ == "__main__":
    key = jax.random.PRNGKey(0)
    keys = jax.random.split(key, 16)

    # inputs (numerical comes as (B, 2, 5) and is flattened like nn.Flatten)
    numerical_raw = jax.random.normal(keys[0], (B, 2, 5), jnp.float32)
    numerical = numerical_raw.reshape(B, -1)                          # (B, F)
    node_feature = jax.random.normal(keys[1], (B, N, NODE_DIM), jnp.float32)
    edge_part_feature = jax.random.normal(keys[2], (B, E, 5), jnp.float32)
    edge_index = jax.random.randint(keys[3], (B, E, 2), 0, N, jnp.int32)
    edge_mask = jnp.ones((B, E), jnp.bool_)
    stage = jax.nn.one_hot(jax.random.randint(keys[4], (B,), 0, 3), 3,
                           dtype=jnp.float32)                         # (B, 3)

    # deterministic parameters (stored transposed vs. torch: (in, out))
    def init_linear(k, fan_in, fan_out):
        kw, kb = jax.random.split(k)
        bound = 1.0 / jnp.sqrt(fan_in)
        w = jax.random.uniform(kw, (fan_in, fan_out), jnp.float32, -bound, bound)
        b = jax.random.uniform(kb, (1, fan_out), jnp.float32, -bound, bound)
        return w, b

    w0, b0 = init_linear(keys[5], F, HIDDEN[0])
    w1, b1 = init_linear(keys[6], HIDDEN[0], HIDDEN[1])
    wn, bn = init_linear(keys[7], NODE_DIM, D)
    we, be = init_linear(keys[8], NODE_DIM + 5, D)
    params = dict(w0=w0, b0=b0, w1=w1, b1=b1, wn=wn, bn=bn,
                  we_node=we[:NODE_DIM], we_part=we[NODE_DIM:], be=be)

    out = mlp_state_encoder(numerical, node_feature, edge_part_feature,
                            edge_index, edge_mask, stage, params)
    state_policy_road, state_value, edge_mask_out, stage_out = jax.block_until_ready(out)

    # sanity check vs pure-JAX reference
    # TODO(synk): edge_mask / padded nodes are not used in the mean (matches the
    # torch module, which calls mean_features without a mask).
    ref_edges, ref_value = reference(numerical, node_feature, edge_part_feature,
                                     edge_index, stage, params)
    assert state_policy_road.shape == (B, E, D)
    assert state_value.shape == (B, HIDDEN[-1] + 2 * D + 3)
    assert jnp.allclose(state_policy_road, ref_edges, atol=1e-5, rtol=1e-5)
    assert jnp.allclose(state_value, ref_value, atol=1e-5, rtol=1e-5)

    print("KERNEL_OK")
</pallas_src>

<mosaic_0001>
module attributes {stable_mosaic.version = 11 : i64} {
  func.func @mlp_state_encoder_kernel(%arg0: i32, %arg1: memref<2x10xf32, #tpu.memory_space<vmem>>, %arg2: memref<32x6xf32, #tpu.memory_space<vmem>>, %arg3: memref<48x5xf32, #tpu.memory_space<vmem>>, %arg4: memref<48x2xi32, #tpu.memory_space<vmem>>, %arg5: memref<2x128xf32, #tpu.memory_space<vmem>>, %arg6: memref<10x32xf32, #tpu.memory_space<vmem>>, %arg7: memref<1x32xf32, #tpu.memory_space<vmem>>, %arg8: memref<32x128xf32, #tpu.memory_space<vmem>>, %arg9: memref<1x128xf32, #tpu.memory_space<vmem>>, %arg10: memref<6x128xf32, #tpu.memory_space<vmem>>, %arg11: memref<1x128xf32, #tpu.memory_space<vmem>>, %arg12: memref<6x128xf32, #tpu.memory_space<vmem>>, %arg13: memref<5x128xf32, #tpu.memory_space<vmem>>, %arg14: memref<1x128xf32, #tpu.memory_space<vmem>>, %arg15: memref<48x128xf32, #tpu.memory_space<vmem>>, %arg16: memref<2x128xf32, #tpu.memory_space<vmem>>) attributes {dimension_semantics = [#tpu.dimension_semantics<arbitrary>], iteration_bounds = array<i64: 1>, scalar_prefetch = 0 : i64, scratch_operands = 0 : i64, tpu.core_type = #tpu.core_type<tc>, window_params = [{pipeline_mode = #tpu.pipeline_mode<synchronous>, transform_indices = @transform_0, window_bounds = array<i64: 2, 10>}, {pipeline_mode = #tpu.pipeline_mode<synchronous>, transform_indices = @transform_1, window_bounds = array<i64: 32, 6>}, {pipeline_mode = #tpu.pipeline_mode<synchronous>, transform_indices = @transform_2, window_bounds = array<i64: 48, 5>}, {pipeline_mode = #tpu.pipeline_mode<synchronous>, transform_indices = @transform_3, window_bounds = array<i64: 48, 2>}, {pipeline_mode = #tpu.pipeline_mode<synchronous>, transform_indices = @transform_4, window_bounds = array<i64: 2, 128>}, {pipeline_mode = #tpu.pipeline_mode<synchronous>, transform_indices = @transform_5, window_bounds = array<i64: 10, 32>}, {pipeline_mode = #tpu.pipeline_mode<synchronous>, transform_indices = @transform_6, window_bounds = array<i64: 1, 32>}, {pipeline_mode = #tpu.pipeline_mode<synchronous>, transform_indices = @transform_7, window_bounds = array<i64: 32, 128>}, {pipeline_mode = #tpu.pipeline_mode<synchronous>, transform_indices = @transform_8, window_bounds = array<i64: 1, 128>}, {pipeline_mode = #tpu.pipeline_mode<synchronous>, transform_indices = @transform_9, window_bounds = array<i64: 6, 128>}, {pipeline_mode = #tpu.pipeline_mode<synchronous>, transform_indices = @transform_10, window_bounds = array<i64: 1, 128>}, {pipeline_mode = #tpu.pipeline_mode<synchronous>, transform_indices = @transform_11, window_bounds = array<i64: 6, 128>}, {pipeline_mode = #tpu.pipeline_mode<synchronous>, transform_indices = @transform_12, window_bounds = array<i64: 5, 128>}, {pipeline_mode = #tpu.pipeline_mode<synchronous>, transform_indices = @transform_13, window_bounds = array<i64: 1, 128>}, {pipeline_mode = #tpu.pipeline_mode<synchronous>, transform_indices = @transform_14, window_bounds = array<i64: 48, 128>}, {pipeline_mode = #tpu.pipeline_mode<synchronous>, transform_indices = @transform_15, window_bounds = array<i64: 2, 128>}]} {
    %c0 = arith.constant 0 : index
    %c0_0 = arith.constant 0 : index
    %0 = vector.load %arg1[%c0, %c0_0] : memref<2x10xf32, #tpu.memory_space<vmem>>, vector<2x10xf32>
    %c0_1 = arith.constant 0 : index
    %c0_2 = arith.constant 0 : index
    %1 = vector.load %arg6[%c0_1, %c0_2] : memref<10x32xf32, #tpu.memory_space<vmem>>, vector<10x32xf32>
    %cst = arith.constant dense<0.000000e+00> : vector<2x32xf32>
    %2 = tpu.matmul %0, %1, %cst {dimension_numbers = #tpu.dot_dimension_numbers<[1], [0], [0], [1], [0, 0, 1, 1], [], []>} : vector<2x10xf32>, vector<10x32xf32>, vector<2x32xf32> -> vector<2x32xf32>
    %c0_3 = arith.constant 0 : index
    %c0_4 = arith.constant 0 : index
    %3 = vector.load %arg7[%c0_3, %c0_4] : memref<1x32xf32, #tpu.memory_space<vmem>>, vector<1x32xf32>
    %4 = vector.broadcast %3 : vector<1x32xf32> to vector<2x32xf32>
    %5 = arith.addf %2, %4 : vector<2x32xf32>
    %6 = math.tanh %5 : vector<2x32xf32>
    %c0_5 = arith.constant 0 : index
    %c0_6 = arith.constant 0 : index
    %7 = vector.load %arg8[%c0_5, %c0_6] : memref<32x128xf32, #tpu.memory_space<vmem>>, vector<32x128xf32>
    %cst_7 = arith.constant dense<0.000000e+00> : vector<2x128xf32>
    %8 = tpu.matmul %6, %7, %cst_7 {dimension_numbers = #tpu.dot_dimension_numbers<[1], [0], [0], [1], [0, 0, 1, 1], [], []>} : vector<2x32xf32>, vector<32x128xf32>, vector<2x128xf32> -> vector<2x128xf32>
    %c0_8 = arith.constant 0 : index
    %c0_9 = arith.constant 0 : index
    %9 = vector.load %arg9[%c0_8, %c0_9] : memref<1x128xf32, #tpu.memory_space<vmem>>, vector<1x128xf32>
    %10 = vector.broadcast %9 : vector<1x128xf32> to vector<2x128xf32>
    %11 = arith.addf %8, %10 : vector<2x128xf32>
    %12 = math.tanh %11 : vector<2x128xf32>
    %c0_10 = arith.constant 0 : index
    %c0_11 = arith.constant 0 : index
    %13 = vector.load %arg2[%c0_10, %c0_11] : memref<32x6xf32, #tpu.memory_space<vmem>>, vector<32x6xf32>
    %c0_12 = arith.constant 0 : index
    %c0_13 = arith.constant 0 : index
    %14 = vector.load %arg10[%c0_12, %c0_13] : memref<6x128xf32, #tpu.memory_space<vmem>>, vector<6x128xf32>
    %cst_14 = arith.constant dense<0.000000e+00> : vector<32x128xf32>
    %15 = tpu.matmul %13, %14, %cst_14 {dimension_numbers = #tpu.dot_dimension_numbers<[1], [0], [0], [1], [0, 0, 1, 1], [], []>} : vector<32x6xf32>, vector<6x128xf32>, vector<32x128xf32> -> vector<32x128xf32>
    %c0_15 = arith.constant 0 : index
    %c0_16 = arith.constant 0 : index
    %16 = vector.load %arg11[%c0_15, %c0_16] : memref<1x128xf32, #tpu.memory_space<vmem>>, vector<1x128xf32>
    %17 = vector.broadcast %16 : vector<1x128xf32> to vector<32x128xf32>
    %18 = arith.addf %15, %17 : vector<32x128xf32>
    %19 = tpu.iota {dimensions = array<i32: 1>} : vector<2x32xi32>
    %20 = tpu.iota {dimensions = array<i32: 0>} : vector<2x32xi32>
    %c16_i32 = arith.constant 16 : i32
    %21 = vector.broadcast %c16_i32 : i32 to vector<2x32xi32>
    %22 = arith.muli %20, %21 : vector<2x32xi32>
    %23 = arith.cmpi sge, %19, %22 : vector<2x32xi32>
    %c16_i32_17 = arith.constant 16 : i32
    %24 = vector.broadcast %c16_i32_17 : i32 to vector<2x32xi32>
    %25 = arith.muli %20, %24 : vector<2x32xi32>
    %c16_i32_18 = arith.constant 16 : i32
    %26 = vector.broadcast %c16_i32_18 : i32 to vector<2x32xi32>
    %27 = arith.addi %25, %26 : vector<2x32xi32>
    %28 = arith.cmpi slt, %19, %27 : vector<2x32xi32>
    %29 = arith.andi %23, %28 : vector<2x32xi1>
    %30 = arith.extui %29 : vector<2x32xi1> to vector<2x32xi32>
    %31 = arith.sitofp %30 : vector<2x32xi32> to vector<2x32xf32>
    %cst_19 = arith.constant 6.250000e-02 : f32
    %32 = vector.broadcast %cst_19 : f32 to vector<2x32xf32>
    %33 = arith.mulf %31, %32 : vector<2x32xf32>
    %cst_20 = arith.constant dense<0.000000e+00> : vector<2x128xf32>
    %34 = tpu.matmul %33, %18, %cst_20 {dimension_numbers = #tpu.dot_dimension_numbers<[1], [0], [0], [1], [0, 0, 1, 1], [], []>} : vector<2x32xf32>, vector<32x128xf32>, vector<2x128xf32> -> vector<2x128xf32>
    %c0_21 = arith.constant 0 : index
    %c0_22 = arith.constant 0 : index
    %35 = vector.load %arg4[%c0_21, %c0_22] : memref<48x2xi32, #tpu.memory_space<vmem>>, vector<48x2xi32>
    %36 = tpu.iota {dimensions = array<i32: 1>} : vector<48x32xi32>
    %37 = vector.extract_strided_slice %35 {offsets = [0, 0], sizes = [48, 1], strides = [1, 1]} : vector<48x2xi32> to vector<48x1xi32>
    %38 = vector.broadcast %37 : vector<48x1xi32> to vector<48x32xi32>
    %39 = arith.cmpi eq, %38, %36 : vector<48x32xi32>
    %40 = arith.extui %39 : vector<48x32xi1> to vector<48x32xi32>
    %41 = arith.sitofp %40 : vector<48x32xi32> to vector<48x32xf32>
    %42 = vector.extract_strided_slice %35 {offsets = [0, 1], sizes = [48, 1], strides = [1, 1]} : vector<48x2xi32> to vector<48x1xi32>
    %43 = vector.broadcast %42 : vector<48x1xi32> to vector<48x32xi32>
    %44 = arith.cmpi eq, %43, %36 : vector<48x32xi32>
    %45 = arith.extui %44 : vector<48x32xi1> to vector<48x32xi32>
    %46 = arith.sitofp %45 : vector<48x32xi32> to vector<48x32xf32>
    %47 = arith.addf %41, %46 : vector<48x32xf32>
    %c0_23 = arith.constant 0 : index
    %c0_24 = arith.constant 0 : index
    %48 = vector.load %arg12[%c0_23, %c0_24] : memref<6x128xf32, #tpu.memory_space<vmem>>, vector<6x128xf32>
    %cst_25 = arith.constant 5.000000e-01 : f32
    %49 = vector.broadcast %cst_25 : f32 to vector<6x128xf32>
    %50 = arith.mulf %48, %49 : vector<6x128xf32>
    %cst_26 = arith.constant dense<0.000000e+00> : vector<32x128xf32>
    %51 = tpu.matmul %13, %50, %cst_26 {dimension_numbers = #tpu.dot_dimension_numbers<[1], [0], [0], [1], [0, 0, 1, 1], [], []>} : vector<32x6xf32>, vector<6x128xf32>, vector<32x128xf32> -> vector<32x128xf32>
    %cst_27 = arith.constant dense<0.000000e+00> : vector<48x128xf32>
    %52 = tpu.matmul %47, %51, %cst_27 {dimension_numbers = #tpu.dot_dimension_numbers<[1], [0], [0], [1], [0, 0, 1, 1], [], []>} : vector<48x32xf32>, vector<32x128xf32>, vector<48x128xf32> -> vector<48x128xf32>
    %c0_28 = arith.constant 0 : index
    %c0_29 = arith.constant 0 : index
    %53 = vector.load %arg3[%c0_28, %c0_29] : memref<48x5xf32, #tpu.memory_space<vmem>>, vector<48x5xf32>
    %c0_30 = arith.constant 0 : index
    %c0_31 = arith.constant 0 : index
    %54 = vector.load %arg13[%c0_30, %c0_31] : memref<5x128xf32, #tpu.memory_space<vmem>>, vector<5x128xf32>
    %cst_32 = arith.constant dense<0.000000e+00> : vector<48x128xf32>
    %55 = tpu.matmul %53, %54, %cst_32 {dimension_numbers = #tpu.dot_dimension_numbers<[1], [0], [0], [1], [0, 0, 1, 1], [], []>} : vector<48x5xf32>, vector<5x128xf32>, vector<48x128xf32> -> vector<48x128xf32>
    %56 = arith.addf %52, %55 : vector<48x128xf32>
    %c0_33 = arith.constant 0 : index
    %c0_34 = arith.constant 0 : index
    %57 = vector.load %arg14[%c0_33, %c0_34] : memref<1x128xf32, #tpu.memory_space<vmem>>, vector<1x128xf32>
    %58 = vector.broadcast %57 : vector<1x128xf32> to vector<48x128xf32>
    %59 = arith.addf %56, %58 : vector<48x128xf32>
    %c0_35 = arith.constant 0 : index
    %c0_36 = arith.constant 0 : index
    %60 = vector.load %arg15[%c0_35, %c0_36] : memref<48x128xf32, #tpu.memory_space<vmem>>, vector<48x128xf32>
    tpu.vector_store %arg15[%c0_35, %c0_36], %59 {strides = array<i32>} : memref<48x128xf32, #tpu.memory_space<vmem>>, vector<48x128xf32>,
    %61 = tpu.iota {dimensions = array<i32: 1>} : vector<2x48xi32>
    %62 = tpu.iota {dimensions = array<i32: 0>} : vector<2x48xi32>
    %c24_i32 = arith.constant 24 : i32
    %63 = vector.broadcast %c24_i32 : i32 to vector<2x48xi32>
    %64 = arith.muli %62, %63 : vector<2x48xi32>
    %65 = arith.cmpi sge, %61, %64 : vector<2x48xi32>
    %c24_i32_37 = arith.constant 24 : i32
    %66 = vector.broadcast %c24_i32_37 : i32 to vector<2x48xi32>
    %67 = arith.muli %62, %66 : vector<2x48xi32>
    %c24_i32_38 = arith.constant 24 : i32
    %68 = vector.broadcast %c24_i32_38 : i32 to vector<2x48xi32>
    %69 = arith.addi %67, %68 : vector<2x48xi32>
    %70 = arith.cmpi slt, %61, %69 : vector<2x48xi32>
    %71 = arith.andi %65, %70 : vector<2x48xi1>
    %72 = arith.extui %71 : vector<2x48xi1> to vector<2x48xi32>
    %73 = arith.sitofp %72 : vector<2x48xi32> to vector<2x48xf32>
    %cst_39 = arith.constant 0.0416666679 : f32
    %74 = vector.broadcast %cst_39 : f32 to vector<2x48xf32>
    %75 = arith.mulf %73, %74 : vector<2x48xf32>
    %cst_40 = arith.constant dense<0.000000e+00> : vector<2x128xf32>
    %76 = tpu.matmul %75, %59, %cst_40 {dimension_numbers = #tpu.dot_dimension_numbers<[1], [0], [0], [1], [0, 0, 1, 1], [], []>} : vector<2x48xf32>, vector<48x128xf32>, vector<2x128xf32> -> vector<2x128xf32>
    %77 = arith.addf %12, %34 : vector<2x128xf32>
    %78 = arith.addf %77, %76 : vector<2x128xf32>
    %c0_41 = arith.constant 0 : index
    %c0_42 = arith.constant 0 : index
    %79 = vector.load %arg5[%c0_41, %c0_42] : memref<2x128xf32, #tpu.memory_space<vmem>>, vector<2x128xf32>
    %80 = arith.addf %78, %79 : vector<2x128xf32>
    %c0_43 = arith.constant 0 : index
    %c0_44 = arith.constant 0 : index
    %81 = vector.load %arg16[%c0_43, %c0_44] : memref<2x128xf32, #tpu.memory_space<vmem>>, vector<2x128xf32>
    tpu.vector_store %arg16[%c0_43, %c0_44], %80 {strides = array<i32>} : memref<2x128xf32, #tpu.memory_space<vmem>>, vector<2x128xf32>,
    return
  }
  func.func @transform_0(%arg0: i32) -> (i32, i32) {
    %c0_i32 = arith.constant 0 : i32
    %c0_i32_0 = arith.constant 0 : i32
    %c0_i32_1 = arith.constant 0 : i32
    return %c0_i32, %c0_i32_0 : i32, i32
  }
  func.func @transform_1(%arg0: i32) -> (i32, i32) {
    %c0_i32 = arith.constant 0 : i32
    %c0_i32_0 = arith.constant 0 : i32
    %c0_i32_1 = arith.constant 0 : i32
    return %c0_i32, %c0_i32_0 : i32, i32
  }
  func.func @transform_2(%arg0: i32) -> (i32, i32) {
    %c0_i32 = arith.constant 0 : i32
    %c0_i32_0 = arith.constant 0 : i32
    %c0_i32_1 = arith.constant 0 : i32
    return %c0_i32, %c0_i32_0 : i32, i32
  }
  func.func @transform_3(%arg0: i32) -> (i32, i32) {
    %c0_i32 = arith.constant 0 : i32
    %c0_i32_0 = arith.constant 0 : i32
    %c0_i32_1 = arith.constant 0 : i32
    return %c0_i32, %c0_i32_0 : i32, i32
  }
  func.func @transform_4(%arg0: i32) -> (i32, i32) {
    %c0_i32 = arith.constant 0 : i32
    %c0_i32_0 = arith.constant 0 : i32
    %c0_i32_1 = arith.constant 0 : i32
    return %c0_i32, %c0_i32_0 : i32, i32
  }
  func.func @transform_5(%arg0: i32) -> (i32, i32) {
    %c0_i32 = arith.constant 0 : i32
    %c0_i32_0 = arith.constant 0 : i32
    %c0_i32_1 = arith.constant 0 : i32
    return %c0_i32, %c0_i32_0 : i32, i32
  }
  func.func @transform_6(%arg0: i32) -> (i32, i32) {
    %c0_i32 = arith.constant 0 : i32
    %c0_i32_0 = arith.constant 0 : i32
    %c0_i32_1 = arith.constant 0 : i32
    return %c0_i32, %c0_i32_0 : i32, i32
  }
  func.func @transform_7(%arg0: i32) -> (i32, i32) {
    %c0_i32 = arith.constant 0 : i32
    %c0_i32_0 = arith.constant 0 : i32
    %c0_i32_1 = arith.constant 0 : i32
    return %c0_i32, %c0_i32_0 : i32, i32
  }
  func.func @transform_8(%arg0: i32) -> (i32, i32) {
    %c0_i32 = arith.constant 0 : i32
    %c0_i32_0 = arith.constant 0 : i32
    %c0_i32_1 = arith.constant 0 : i32
    return %c0_i32, %c0_i32_0 : i32, i32
  }
  func.func @transform_9(%arg0: i32) -> (i32, i32) {
    %c0_i32 = arith.constant 0 : i32
    %c0_i32_0 = arith.constant 0 : i32
    %c0_i32_1 = arith.constant 0 : i32
    return %c0_i32, %c0_i32_0 : i32, i32
  }
  func.func @transform_10(%arg0: i32) -> (i32, i32) {
    %c0_i32 = arith.constant 0 : i32
    %c0_i32_0 = arith.constant 0 : i32
    %c0_i32_1 = arith.constant 0 : i32
    return %c0_i32, %c0_i32_0 : i32, i32
  }
  func.func @transform_11(%arg0: i32) -> (i32, i32) {
    %c0_i32 = arith.constant 0 : i32
    %c0_i32_0 = arith.constant 0 : i32
    %c0_i32_1 = arith.constant 0 : i32
    return %c0_i32, %c0_i32_0 : i32, i32
  }
  func.func @transform_12(%arg0: i32) -> (i32, i32) {
    %c0_i32 = arith.constant 0 : i32
    %c0_i32_0 = arith.constant 0 : i32
    %c0_i32_1 = arith.constant 0 : i32
    return %c0_i32, %c0_i32_0 : i32, i32
  }
  func.func @transform_13(%arg0: i32) -> (i32, i32) {
    %c0_i32 = arith.constant 0 : i32
    %c0_i32_0 = arith.constant 0 : i32
    %c0_i32_1 = arith.constant 0 : i32
    return %c0_i32, %c0_i32_0 : i32, i32
  }
  func.func @transform_14(%arg0: i32) -> (i32, i32) {
    %c0_i32 = arith.constant 0 : i32
    %c0_i32_0 = arith.constant 0 : i32
    %c0_i32_1 = arith.constant 0 : i32
    return %c0_i32, %c0_i32_0 : i32, i32
  }
  func.func @transform_15(%arg0: i32) -> (i32, i32) {
    %c0_i32 = arith.constant 0 : i32
    %c0_i32_0 = arith.constant 0 : i32
    %c0_i32_1 = arith.constant 0 : i32
    return %c0_i32, %c0_i32_0 : i32, i32
  }
}

</mosaic_0001>

<bundles_post_ra>
// kernel: tpu_custom_call.1
= control target key start
LH: loop header
LB: loop body
LE: loop exit
PB: predicated region body
PF: predicated region fallthrough
CT: control target
= control target key end

     0   :  { %21 = vsyncpa [#allocation3], 0  ;;  %vm62_vm0 = vcmask 1041408   ;;  %vm58_vm1 = vcmask 80896   ;;  %s909_s0 = inlined_call_operand.vmem [shape: f32[2,10], index: 0, kind: input, shape index: {}]   ;;  %s910_s1 = inlined_call_operand.vmem [shape: f32[32,6], index: 1, kind: input, shape index: {}]   ;;  %s911_s2 = inlined_call_operand.vmem [shape: f32[48,5], index: 2, kind: input, shape index: {}]   ;;  %s912_s3 = inlined_call_operand.vmem [shape: s32[48,2], index: 3, kind: input, shape index: {}]   ;;  %s913_s4 = inlined_call_operand.vmem [shape: f32[2,128], index: 4, kind: input, shape index: {}]   ;;  %s914_s5 = inlined_call_operand.vmem [shape: f32[10,32], index: 5, kind: input, shape index: {}]   ;;  %s915_s6 = inlined_call_operand.vmem [shape: f32[1,32], index: 6, kind: input, shape index: {}]   ;;  %s916_s7 = inlined_call_operand.vmem [shape: f32[32,128], index: 7, kind: input, shape index: {}]   ;;  %s917_s8 = inlined_call_operand.vmem [shape: f32[1,128], index: 8, kind: input, shape index: {}]   ;;  %s918_s9 = inlined_call_operand.vmem [shape: f32[6,128], index: 9, kind: input, shape index: {}]   ;;  %s919_s10 = inlined_call_operand.vmem [shape: f32[1,128], index: 10, kind: input, shape index: {}]   ;;  %s920_s11 = inlined_call_operand.vmem [shape: f32[6,128], index: 11, kind: input, shape index: {}]   ;;  %s921_s12 = inlined_call_operand.vmem [shape: f32[5,128], index: 12, kind: input, shape index: {}]   ;;  %s922_s13 = inlined_call_operand.vmem [shape: f32[1,128], index: 13, kind: input, shape index: {}]   ;;  %s923_s14 = inlined_call_operand.hbm [shape: f32[48,128], index: 14, kind: output, shape index: {0}]   ;;  %s924_s15 = inlined_call_operand.hbm [shape: f32[2,128], index: 15, kind: output, shape index: {1}]  }
   0x1   :  { %v53_v0 = vld [vmem:[%s914_s5 + $0x8] sm:$0x3]  ;;  %v52_v1 = vld [vmem:[%s914_s5] sm:$0xff] }
   0x2   :  { %533 = vmatpush.msk.msra.mxu0 %vm62_vm0, %v53_v0  ;;  %v51_v2 = vld [vmem:[%s909_s0] sm:$0x3] }
   0x4   :  { %81 = vmatpush.msra.mxu0 %v52_v1 }
   0x5   :  { %22 = vsyncpa [#allocation5], 0  ;;  %534 = vmatmul.msk.f32.vlgmr.msra.gmra.mxu0 %vm58_vm1, %v51_v2  ;;  %v90_v3 = vld [vmem:[%s916_s7 + $0x18] sm:$0xff]  ;;  %v89_v4 = vld [vmem:[%s916_s7 + $0x10] sm:$0xff]  ;;  %vm142_vm2 = vcmask 1045504   ;;  %vm95_vm3 = vcmask 261120   ;;  %v175_v18 = vlaneseq }
   0x6   :  { %111 = vmatpush.msra.mxu2 %v90_v3  ;;  %v88_v5 = vld [vmem:[%s916_s7 + $0x8] sm:$0xff]  ;;  %v87_v6 = vld [vmem:[%s916_s7] sm:$0xff]  ;;  %vm129_vm4 = vcmask 48128   ;;  %v122_v14 = vld [vmem:[%s910_s1 + $0x10] sm:$0xff]  ;;  %v653_v30 = vmov 0.0   ;;  %v654_v32 = vmov 0  }
   0x7   :  { %v124_v7 = vld [vmem:[%s918_s9] sm:$0x3f]  ;;  %v121_v13 = vld [vmem:[%s910_s1 + $0x8] sm:$0xff]  ;;  %v784_v15 = vld [vmem:[%s910_s1 + $0x18] sm:$0xff]  ;;  %v790_v20 = vshrl.u32 %v175_v18, 7  ;;  %v793_v23 = vand.u32 127, %v175_v18  ;;  %582 = vset.pattern.permute.xlu0 %v654_v32  ;;  %584 = vset.pattern.permute.xlu1 %v654_v32 }
   0x8   :  { %112 = vmatpush.msra.mxu2 %v89_v4  ;;  %v593_v8 = vld [vmem:[%s915_s6] ss:$0 sm:$0xff]  ;;  %586 = vset.pattern.permute.xlu2 %v654_v32  ;;  %v211_v38 = vld [vmem:[%s912_s3 + $0x8] sm:$0xff]  ;;  %v212_v39 = vld [vmem:[%s912_s3 + $0x10] sm:$0xff]  ;;  %v655_v40 = vmov 1   ;;  %vm354_vm8 = vcmask 1044480  }
   0x9   :  { %v120_v12 = vld [vmem:[%s910_s1] sm:$0xff]  ;;  %v179_v21 = vmul.u32 16, %v790_v20  ;;  %220 = vperm.xlu1 %584, %v211_v38   ;;  %223 = vperm.xlu2 %586, %v212_v39   ;;  %v213_v42 = vld [vmem:[%s912_s3 + $0x18] sm:$0xff]  ;;  %v215_v43 = vld [vmem:[%s912_s3 + $0x28] sm:$0xff]  ;;  %vm335_vm9 = vcmask 39936   ;;  %s657_s30 = smov 128  }
   0xa   :  { %113 = vmatpush.msra.mxu2 %v88_v5  ;;  %v595_v25 = vld [vmem:[%s919_s10] ss:$0 sm:$0xff]  ;;  %v329_v53 = vld [vmem:[%s911_s2 + $0x8] sm:$0xff]  ;;  %v330_v56 = vld [vmem:[%s911_s2 + $0x10] sm:$0xff]  ;;  %s658_s16 = smov 8   ;;  %s659_s7 = smov [#allocation4]  }
   0xb   :  { %v181_v24 = vadd.s32 16, %v179_v21  ;;  %vm180_vm5 = vcmp.ge.s32.totalorder %v793_v23, %v179_v21  ;;  %v210_v28 = vld [vmem:[%s912_s3] sm:$0xff]  ;;  %v331_v60 = vld [vmem:[%s911_s2 + $0x18] sm:$0xff]  ;;  %s517_s19 = sshll.u32 %s659_s7, 4  ;;  %s519_s20 = sshll.u32 %s924_s15, 4  ;;  %s518_s19 = int_to_ptr.vmem [resolvable:$true] %s517_s19  ;;  %s520_s20 = int_to_ptr.hbm [resolvable:$true] %s519_s20 }
   0xc   :  { %114 = vmatpush.msra.mxu2 %v87_v6  ;;  %v294_v33 = vld [vmem:[%s920_s11] sm:$0x3f]  ;;  %217 = vperm.xlu0 %582, %v210_v28   ;;  %s505_s11 = sshll.u32 %s923_s14, 4  ;;  %s506_s11 = int_to_ptr.hbm [resolvable:$true] %s505_s11 }
   0xd   :  { %vm182_vm6 = vcmp.lt.s32.totalorder %v793_v23, %v181_v24  ;;  %v295_v37 = vmul.f32 0.5, %v294_v33  ;;  %v214_v41 = vld [vmem:[%s912_s3 + $0x20] sm:$0xff] }
   0xe   :  { %536 = vmatpush.msk.msrb.mxu2 %vm142_vm2, %v124_v7  ;;  %vm183_vm7 = vmand %vm180_vm5, %vm182_vm6  ;;  %v594_v44 = vld [vmem:[%s917_s8] ss:$0 sm:$0xff]  ;;  %v333_v7 = vld [vmem:[%s911_s2 + $0x28] sm:$0xff] }
   0xf   :  { %v541_v31 = vsel %vm183_vm7, 1.0, %v653_v30  ;;  %v334_v50 = vld [vmem:[%s921_s12] sm:$0x1f] }
  0x10   :  { %v186_v35 = vmul.f32 0.0625, %v541_v31  ;;  %v328_v51 = vld [vmem:[%s911_s2] sm:$0xff]  ;;  %560 = vmatpush.msk.msra.mxu1 %vm354_vm8, %v334_v50  ;;  %v462_v50 = vmul.u32 24, %v790_v20 }
  0x11   :  { %585 = vset.pattern.permute.xlu1 %v655_v40  ;;  %587 = vset.pattern.permute.xlu2 %v655_v40  ;;  %v332_v2 = vld [vmem:[%s911_s2 + $0x20] sm:$0xff] }
  0x12   :  { %256 = vperm.xlu1 %585, %v211_v38   ;;  %259 = vperm.xlu2 %587, %v212_v39   ;;  %v596_v31 = vld [vmem:[%s922_s13] ss:$0 sm:$0xff]  ;;  %s656_s13 = smov [#allocation2]  }
  0x13   :  { %561 = vmatmul.msk.f32.vlgmr.msra.gmra.mxu1 %vm335_vm9, %v328_v51  ;;  %s503_s5 = sshll.u32 %s656_s13, 4  ;;  %s504_s5 = int_to_ptr.vmem [resolvable:$true] %s503_s5 }
  0x14   :  { %583 = vset.pattern.permute.xlu0 %v655_v40 }
  0x15   :  { %253 = vperm.xlu0 %583, %v210_v28  }
  0x1a   :  { %588 = vset.pattern.permute.xlu1 %v654_v32  ;;  %262 = vperm.xlu2 %587, %v213_v42  }
  0x1b   :  { %226 = vperm.xlu1 %588, %v213_v42   ;;  %562 = vmatmul.msk.f32.gmra.mxu1 %vm335_vm9, %v329_v53  ;;  %v464_v53 = vadd.s32 24, %v462_v50 }
  0x1d   :  { %589 = vset.pattern.permute.xlu0 %v654_v32  ;;  %vm465_vm7 = vcmp.lt.s32.totalorder %v793_v23, %v464_v53 }
  0x1e   :  { %229 = vperm.xlu0 %589, %v214_v41  }
  0x22   :  { %591 = vset.pattern.permute.xlu2 %v654_v32 }
  0x23   :  { %590 = vset.pattern.permute.xlu1 %v655_v40  ;;  %232 = vperm.xlu2 %591, %v215_v43  }
  0x24   :  { %265 = vperm.xlu1 %590, %v214_v41   ;;  %563 = vmatmul.msk.f32.gmra.mxu1 %vm335_vm9, %v330_v56 }
  0x26   :  { %592 = vset.pattern.permute.xlu0 %v655_v40 }
  0x2c   :  { %268 = vperm.xlu1 %590, %v215_v43   ;;  %564 = vmatmul.msk.f32.gmra.mxu1 %vm335_vm9, %v331_v60 }
  0x34   :  { %565 = vmatmul.msk.f32.gmra.mxu1 %vm335_vm9, %v332_v2 }
  0x3c   :  { %566 = vmatmul.msk.f32.gmra.mxu1 %vm335_vm9, %v333_v7  ;;  %vm470_vm9 = vcmask 392192  }
  0x63   :  { %v224_v61 = vpop.permute.xlu2 %223 }
  0x64   :  { %vm236_vm14 = vcmp.eq.s32.totalorder %v224_v61, %v793_v23 }
  0x6c   :  { %v260_v5 = vpop.permute.xlu2 %259 }
  0x6d   :  { %vm272_vm15 = vcmp.eq.s32.totalorder %v260_v5, %v793_v23 }
  0x7b   :  { %v221_v57 = vpop.permute.xlu1 %220 }
  0x7c   :  { %vm235_vm12 = vcmp.eq.s32.totalorder %v221_v57, %v793_v23 }
  0x7d   :  { %v544_v3 = vsel %vm235_vm12, 1.0, %v653_v30 }
  0x7e   :  { %v218_v54 = vpop.permute.xlu0 %217 }
  0x7f   :  { %vm234_vm10 = vcmp.eq.s32.totalorder %v218_v54, %v793_v23 }
  0x80   :  { %v543_v62 = vsel %vm234_vm10, 1.0, %v653_v30 }
  0x82   :  { %v83_v9 = vpop.f32.mrf.mxu0 }
  0x83   :  { %v84_v10 = vadd.f32 %v593_v8, %v83_v9  ;;  %v545_v9 = vsel %vm236_vm14, 1.0, %v653_v30 }
  0x84   :  { %v257_v0 = vpop.permute.xlu1 %256 }
  0x85   :  { %597 = vtanh.f32 %v84_v10  ;;  %vm271_vm13 = vcmp.eq.s32.totalorder %v257_v0, %v793_v23  ;;  %v551_v10 = vsel %vm272_vm15, 1.0, %v653_v30 }
  0x86   :  { %v550_v4 = vsel %vm271_vm13, 1.0, %v653_v30 }
  0x87   :  { %v254_v58 = vpop.permute.xlu0 %253  ;;  %v289_v6 = vadd.f32 %v550_v4, %v544_v3 }
  0x88   :  { %vm270_vm11 = vcmp.eq.s32.totalorder %v254_v58, %v793_v23 }
  0x89   :  { %v549_v63 = vsel %vm270_vm11, 1.0, %v653_v30 }
  0x8a   :  { %v288_v1 = vadd.f32 %v549_v63, %v543_v62 }
  0x8b   :  { %v598_v11 = vpop.eup %597 }
  0x8c   :  { %535 = vmatmul.msk.f32.vlgmr.msra.gmra.mxu2 %vm95_vm3, %v598_v11  ;;  %v263_v11 = vpop.permute.xlu2 %262 }
  0x8d   :  { %v227_v8 = vpop.permute.xlu1 %226  ;;  %vm273_vm0 = vcmp.eq.s32.totalorder %v263_v11, %v793_v23 }
  0x8e   :  { %vm237_vm1 = vcmp.eq.s32.totalorder %v227_v8, %v793_v23 }
  0x90   :  { %v375_v28 = vpop.f32.mrf.mxu1 }
  0x94   :  { %537 = vmatmul.msk.f32.vlgmr.msrb.gmra.mxu2 %vm129_vm4, %v120_v12 }
  0x9c   :  { %538 = vmatmul.msk.f32.gmra.mxu2 %vm129_vm4, %v121_v13 }
  0xa4   :  { %539 = vmatmul.msk.f32.gmra.mxu2 %vm129_vm4, %v122_v14 }
  0xac   :  { %540 = vmatmul.msk.f32.gmra.mxu2 %vm129_vm4, %v784_v15 }
 0x10f   :  { %v788_v16 = vpop.f32.mrf.mxu2 }
 0x110   :  { %v117_v45 = vadd.f32 %v594_v44, %v788_v16  ;;  %v230_v16 = vpop.permute.xlu0 %229 }
 0x112   :  { %599 = vtanh.f32 %v117_v45 }
 0x117   :  { %v163_v17 = vpop.f32.mrf.mxu2 }
 0x118   :  { %v164_v36 = vadd.f32 %v595_v25, %v163_v17  ;;  %v600_v46 = vpop.eup %599 }
 0x11f   :  { %v166_v19 = vpop.f32.mrf.mxu2 }
 0x120   :  { %v167_v34 = vadd.f32 %v595_v25, %v166_v19 }
 0x127   :  { %v169_v22 = vpop.f32.mrf.mxu2 }
 0x128   :  { %v170_v29 = vadd.f32 %v595_v25, %v169_v22  ;;  %v233_v22 = vpop.permute.xlu2 %232 }
 0x129   :  { %vm239_vm5 = vcmp.eq.s32.totalorder %v233_v22, %v793_v23 }
 0x12f   :  { %v172_v26 = vpop.f32.mrf.mxu2 }
 0x130   :  { %v173_v27 = vadd.f32 %v595_v25, %v172_v26  ;;  %v548_v25 = vsel %vm239_vm5, 1.0, %v653_v30 }
 0x132   :  { %202 = vmatpush.msrb.mxu0 %v173_v27 }
 0x134   :  { %203 = vmatpush.msrb.mxu0 %v170_v29  ;;  %v378_v29 = vpop.f32.mrf.mxu1 }
 0x136   :  { %204 = vmatpush.msrb.mxu0 %v167_v34 }
 0x138   :  { %205 = vmatpush.msrb.mxu0 %v164_v36 }
 0x139   :  { %542 = vmatmul.msk.f32.vlgmr.msrb.gmra.mxu0 %vm95_vm3, %v186_v35 }
 0x13a   :  { %555 = vmatpush.msk.msra.mxu0 %vm142_vm2, %v295_v37 }
 0x13c   :  { %v381_v36 = vpop.f32.mrf.mxu1 }
 0x141   :  { %556 = vmatmul.msk.f32.vlgmr.msra.gmra.mxu0 %vm129_vm4, %v120_v12  ;;  %v290_v12 = vadd.f32 %v551_v10, %v545_v9 }
 0x144   :  { %v384_v41 = vpop.f32.mrf.mxu1 }
 0x149   :  { %557 = vmatmul.msk.f32.gmra.mxu0 %vm129_vm4, %v121_v13  ;;  %v552_v13 = vsel %vm273_vm0, 1.0, %v653_v30 }
 0x151   :  { %558 = vmatmul.msk.f32.gmra.mxu0 %vm129_vm4, %v122_v14  ;;  %v546_v14 = vsel %vm237_vm1, 1.0, %v653_v30 }
 0x152   :  { %v291_v17 = vadd.f32 %v552_v13, %v546_v14 }
 0x159   :  { %559 = vmatmul.msk.f32.gmra.mxu0 %vm129_vm4, %v784_v15  ;;  %v266_v15 = vpop.permute.xlu1 %265  ;;  %vm238_vm4 = vcmp.eq.s32.totalorder %v230_v16, %v793_v23 }
 0x15a   :  { %vm274_vm2 = vcmp.eq.s32.totalorder %v266_v15, %v793_v23  ;;  %v547_v19 = vsel %vm238_vm4, 1.0, %v653_v30 }
 0x15b   :  { %v553_v18 = vsel %vm274_vm2, 1.0, %v653_v30 }
 0x15c   :  { %v292_v21 = vadd.f32 %v553_v18, %v547_v19 }
 0x161   :  { %v269_v24 = vpop.permute.xlu1 %268 }
 0x162   :  { %vm275_vm6 = vcmp.eq.s32.totalorder %v269_v24, %v793_v23 }
 0x163   :  { %v554_v26 = vsel %vm275_vm6, 1.0, %v653_v30 }
 0x164   :  { %v293_v27 = vadd.f32 %v554_v26, %v548_v25 }
 0x1b6   :  { %v207_v47 = vpop.f32.mrf.mxu0 }
 0x1b7   :  { %v833_v48 = vadd.f32 %v600_v46, %v207_v47  ;;  %v387_v46 = vpop.f32.mrf.mxu1 }
 0x1be   :  { %v316_v49 = vpop.f32.mrf.mxu0 }
 0x1c6   :  { %v319_v52 = vpop.f32.mrf.mxu0 }
 0x1ce   :  { %v322_v55 = vpop.f32.mrf.mxu0 }
 0x1d6   :  { %v325_v59 = vpop.f32.mrf.mxu0 }
 0x1d7   :  { %423 = vmatpush.msra.mxu3 %v325_v59 }
 0x1d9   :  { %424 = vmatpush.msra.mxu3 %v322_v55 }
 0x1db   :  { %425 = vmatpush.msra.mxu3 %v319_v52  ;;  %v390_v52 = vpop.f32.mrf.mxu1 }
 0x1dd   :  { %426 = vmatpush.msra.mxu3 %v316_v49 }
 0x1de   :  { %567 = vmatmul.msk.f32.vlgmr.msra.gmra.mxu3 %vm95_vm3, %v288_v1 }
 0x1e6   :  { %568 = vmatmul.msk.f32.gmra.mxu3 %vm95_vm3, %v289_v6 }
 0x1ee   :  { %569 = vmatmul.msk.f32.gmra.mxu3 %vm95_vm3, %v290_v12 }
 0x1f6   :  { %570 = vmatmul.msk.f32.gmra.mxu3 %vm95_vm3, %v291_v17 }
 0x1fe   :  { %571 = vmatmul.msk.f32.gmra.mxu3 %vm95_vm3, %v292_v21 }
 0x206   :  { %572 = vmatmul.msk.f32.gmra.mxu3 %vm95_vm3, %v293_v27  ;;  %vm463_vm3 = vcmp.ge.s32.totalorder %v793_v23, %v462_v50 }
 0x207   :  { %vm466_vm8 = vmand %vm463_vm3, %vm465_vm7 }
 0x208   :  { %v573_v57 = vsel %vm466_vm8, 1.0, %v653_v30  ;;  %v496_v30 = vld [vmem:[%s913_s4] sm:$0x3] }
 0x209   :  { %v469_v20 = vmul.f32 0.041666668, %v573_v57 }
 0x261   :  { %v428_v32 = vpop.f32.mrf.mxu3 }
 0x262   :  { %v429_v33 = vadd.f32 %v428_v32, %v375_v28 }
 0x264   :  { %v450_v34 = vadd.f32 %v596_v31, %v429_v33 }
 0x266   :  { %456 = vst [vmem:[#allocation2] sm:$0xff] %v450_v34 }
 0x269   :  { %v431_v35 = vpop.f32.mrf.mxu3 }
 0x26a   :  { %v432_v37 = vadd.f32 %v431_v35, %v378_v29 }
 0x26c   :  { %v451_v38 = vadd.f32 %v596_v31, %v432_v37 }
 0x26e   :  { %457 = vst [vmem:[#allocation2 + $0x8] sm:$0xff] %v451_v38 }
 0x271   :  { %v434_v39 = vpop.f32.mrf.mxu3 }
 0x272   :  { %v435_v40 = vadd.f32 %v434_v39, %v381_v36 }
 0x274   :  { %v452_v42 = vadd.f32 %v596_v31, %v435_v40 }
 0x276   :  { %458 = vst [vmem:[#allocation2 + $0x10] sm:$0xff] %v452_v42 }
 0x279   :  { %v437_v43 = vpop.f32.mrf.mxu3 }
 0x27a   :  { %v438_v44 = vadd.f32 %v437_v43, %v384_v41 }
 0x27c   :  { %v453_v45 = vadd.f32 %v596_v31, %v438_v44 }
 0x27e   :  { %459 = vst [vmem:[#allocation2 + $0x18] sm:$0xff] %v453_v45 }
 0x281   :  { %v440_v47 = vpop.f32.mrf.mxu3 }
 0x282   :  { %v441_v49 = vadd.f32 %v440_v47, %v387_v46 }
 0x284   :  { %v454_v51 = vadd.f32 %v596_v31, %v441_v49 }
 0x286   :  { %460 = vst [vmem:[#allocation2 + $0x20] sm:$0xff] %v454_v51 }
 0x289   :  { %v443_v54 = vpop.f32.mrf.mxu3 }
 0x28a   :  { %v444_v55 = vadd.f32 %v443_v54, %v390_v52 }
 0x28c   :  { %v455_v56 = vadd.f32 %v596_v31, %v444_v55 }
 0x28e   :  { %461 = vst [vmem:[#allocation2 + $0x28] sm:$0xff] %v455_v56  ;;  %484 = vmatpush.msra.mxu2 %v455_v56 }
 0x28f   :  { %511 = dma.vmem_to_hbm [thread:$0]  %s504_s5, 768, %s506_s11, [#allocation3], %s657_s30, %s657_s30, %s658_s16  }
 0x290   :  { %485 = vmatpush.msra.mxu2 %v454_v51 }
 0x292   :  { %486 = vmatpush.msra.mxu2 %v453_v45 }
 0x294   :  { %487 = vmatpush.msra.mxu2 %v452_v42 }
 0x296   :  { %488 = vmatpush.msra.mxu2 %v451_v38 }
 0x298   :  { %489 = vmatpush.msra.mxu2 %v450_v34 }
 0x299   :  { %574 = vmatmul.msk.f32.vlgmr.msra.gmra.mxu2 %vm470_vm9, %v469_v20 }
 0x31c   :  { %v491_v23 = vpop.f32.mrf.mxu2 }
 0x31d   :  { %v495_v58 = vadd.f32 %v833_v48, %v491_v23 }
 0x31f   :  { %v497_v59 = vadd.f32 %v496_v30, %v495_v58 }
 0x321   :  { %498 = vst [vmem:[#allocation4] sm:$0x3] %v497_v59 }
 0x322   :  { %522 = dma.vmem_to_hbm [thread:$0]  %s518_s19, 32, %s520_s20, [#allocation5]  }
 0x323   :  { %649 = dma.done.wait [#allocation3], 768  }
 0x324   :  { %650 = vsyncadd [#allocation3], 4294966528 }
 0x325   :  { %651 = dma.done.wait [#allocation5], 32  }
 0x326   :  { %652 = vsyncadd [#allocation5], 4294967264 }
 0x327   :  { %531 = vsyncpa [#allocation3], 1 }
 0x328   :  { %532 = vsyncpa [#allocation5], 1 }

</bundles_post_ra>
